<compile_context>
chip_gen: v7x
topology: tpu7x:2x2x1
jax: 0.10.0
libtpu: 0.0.40
codegen_flags: <defaults>
</compile_context>

<pallas_src>
import functools

import jax
import jax.numpy as jnp
from jax.experimental import pallas as pl
from jax.experimental.pallas import tpu as pltpu


_OUT_PAD = 128  # lane-dense output width; q lives in cols 0..A-1, zeros beyond


# ---------------------------------------------------------------------------
# Fused kernel: placeholder feature extractor + merged dueling heads
# ---------------------------------------------------------------------------
def _dqn_fused_kernel(x_ref, w_in_ref, b_in_ref, w1_ref, b1_ref, w2_ref, b2_ref,
                      q_ref, *, seq_len):
    rows = x_ref.shape[0]               # bt * S
    bt = rows // seq_len                # batch rows in this tile
    hidden = w_in_ref.shape[1]

    # ---- feature extractor (placeholder HybridAttention) -------------------
    # Cast to the MXU compute dtype INSIDE the kernel: x streams from HBM in
    # its native f32, so there is no extra wrapper-side cast pass over HBM.
    x = x_ref[...].astype(w_in_ref.dtype)
    h = jnp.dot(x, w_in_ref[...], preferred_element_type=jnp.float32)   # [bt*S, H] f32
    h = jnp.maximum(h + b_in_ref[...], 0.0)
    # mean over the sequence axis (sublane reduce)
    # TODO(synk): for very long S, accumulate over S-chunks with lax.fori_loop
    #   to bound this [bt*S, H] buffer instead of shrinking bt.
    feats = jnp.mean(h.reshape(bt, seq_len, hidden), axis=1)            # [bt, H] f32

    # ---- merged dueling heads: two wide matmuls -----------------------------
    h1 = jnp.dot(feats.astype(w1_ref.dtype), w1_ref[...],
                 preferred_element_type=jnp.float32) + b1_ref[...]      # [bt, H]
    h1 = jnp.maximum(h1, 0.0)

    # Dueling combine q = V + A - mean(A) is folded into w2/b2 at pack time,
    # so this matmul emits q directly in cols 0..A-1 (exact zeros elsewhere);
    # the store is a full unmasked 128-lane vst with no epilogue masking.
    q = jnp.dot(h1.astype(w2_ref.dtype), w2_ref[...],
                preferred_element_type=jnp.float32) + b2_ref[...]       # [bt, 128]
    q_ref[...] = q.astype(q_ref.dtype)


# ---------------------------------------------------------------------------
# Parameter packing: merge heads + fold the dueling combine into layer 2
# ---------------------------------------------------------------------------
def pack_params(params, compute_dtype=jnp.bfloat16):
    H = params["w_in"].shape[1]
    H2 = params["w1v"].shape[1]
    A = int(params["w2a"].shape[1])

    # first head layers concatenated along the output axis: [H, H]
    w1 = jnp.concatenate([params["w1v"], params["w1a"]], axis=1)
    b1 = jnp.concatenate([params["b1v"], params["b1a"]], axis=1)

    # Fold q = V + A - mean(A) into the packed second layer (exact identity):
    #   col j (< A): rows [:H2] = w2v[:, 0]                     (value path)
    #                rows [H2:] = w2a[:, j] - mean_k w2a[:, k]  (centered adv)
    #   bias  j      = b2v + b2a[j] - mean_k b2a[k]
    # Columns >= A stay zero, so padded output lanes come out exactly 0.
    w2a_c = params["w2a"] - jnp.mean(params["w2a"], axis=1, keepdims=True)
    b2a_c = params["b2a"] - jnp.mean(params["b2a"], axis=1, keepdims=True)

    w2 = jnp.zeros((H, _OUT_PAD), jnp.float32)
    w2 = w2.at[:H2, :A].set(jnp.broadcast_to(params["w2v"], (H2, A)))
    w2 = w2.at[H2:, :A].set(w2a_c)
    b2 = jnp.zeros((1, _OUT_PAD), jnp.float32)
    b2 = b2.at[:, :A].set(params["b2v"] + b2a_c)

    return {
        # MXU operands in compute dtype (bf16 on v6e/v7x); biases stay f32
        # so all VPU/elementwise work is f32 (required on v5e).
        "w_in": params["w_in"].astype(compute_dtype),
        "b_in": params["b_in"].astype(jnp.float32),
        "w1": w1.astype(compute_dtype),
        "b1": b1.astype(jnp.float32),
        "w2": w2.astype(compute_dtype),
        "b2": b2.astype(jnp.float32),
        "num_actions": A,
    }


# ---------------------------------------------------------------------------
# Wrapper: single fused pallas_call, batch tiled over a 1-D parallel grid
# ---------------------------------------------------------------------------
def dqn_forward(x, packed):
    B, S, D = x.shape
    H = packed["w_in"].shape[1]
    A = packed["num_actions"]
    w_itemsize = jnp.dtype(packed["w_in"].dtype).itemsize
    x_itemsize = jnp.dtype(x.dtype).itemsize

    weight_bytes = ((D * H + H * H + H * _OUT_PAD) * w_itemsize
                    + (H + H + _OUT_PAD) * 4)

    try:
        vmem_cap = pltpu.get_tpu_info().vmem_capacity_bytes
    except Exception:  # query unavailable -> conservative fallback
        vmem_cap = 64 << 20
    # conservative per-TensorCore tiling budget (v7x has half of v6e's VMEM)
    budget = max(8 << 20, min(vmem_cap // 2, 32 << 20))

    def shape_ok(bt):
        # sublane (second-to-last) block dims: multiple of 8 or full extent
        return (((bt * S) % 8 == 0) or bt == B) and ((bt % 8 == 0) or bt == B)

    def working_set(bt):
        ws = 2 * weight_bytes                       # constant-index weights, default 2x buffered
        ws += 2 * bt * S * D * x_itemsize           # double-buffered x tile
        ws += bt * S * H * 4                        # h intermediate (f32)
        ws += 2 * bt * H * 4                        # feats + h1 (f32)
        ws += 2 * bt * _OUT_PAD * 4                 # double-buffered output tile
        return ws

    divisors = [d for d in range(1, B + 1) if B % d == 0 and shape_ok(d)]
    # prefer >= 2 grid programs so the parallel batch axis can shard across
    # v7x's two TensorCores; otherwise take the largest tile that fits.
    bt = None
    for cands in ([d for d in divisors if B // d >= 2], divisors):
        for c in sorted(cands, reverse=True):
            if working_set(c) <= budget:
                bt = c
                break
        if bt is not None:
            break
    if bt is None:
        bt = min(divisors)   # nothing fits the budget; smallest legal tile
    grid = (B // bt,)
    ws = working_set(bt)
    vmem_limit = int(min(max(32 << 20, 2 * ws),
                         max(vmem_cap - (4 << 20), 32 << 20)))

    x2d = x.reshape(B * S, D)   # free contiguous reshape; NO dtype cast here

    kernel = functools.partial(_dqn_fused_kernel, seq_len=S)

    q_pad = pl.pallas_call(
        kernel,
        out_shape=jax.ShapeDtypeStruct((B, _OUT_PAD), jnp.float32),
        grid=grid,
        in_specs=[
            pl.BlockSpec((bt * S, D), lambda i: (i, 0)),        # streamed x tile
            pl.BlockSpec((D, H), lambda i: (0, 0)),             # VMEM-resident weights
            pl.BlockSpec((1, H), lambda i: (0, 0)),
            pl.BlockSpec((H, H), lambda i: (0, 0)),
            pl.BlockSpec((1, H), lambda i: (0, 0)),
            pl.BlockSpec((H, _OUT_PAD), lambda i: (0, 0)),
            pl.BlockSpec((1, _OUT_PAD), lambda i: (0, 0)),
        ],
        out_specs=pl.BlockSpec((bt, _OUT_PAD), lambda i: (i, 0)),
        compiler_params=pltpu.CompilerParams(
            dimension_semantics=("parallel",),
            vmem_limit_bytes=vmem_limit),
    )(x2d, packed["w_in"], packed["b_in"], packed["w1"], packed["b1"],
      packed["w2"], packed["b2"])

    # q already lands lane-dense in cols 0..A-1; downstream code may consume
    # the padded [B, 128] slab directly and skip this slice entirely.
    return q_pad[:, :A]   # q_values [B, A]


# ---------------------------------------------------------------------------
# Deterministic parameter init (xavier_uniform weights, zero biases,
# matching DQN._init_weights). Weights stored as [in, out].
# ---------------------------------------------------------------------------
def _xavier(key, fan_in, fan_out):
    bound = jnp.sqrt(6.0 / (fan_in + fan_out))
    return jax.random.uniform(key, (fan_in, fan_out), jnp.float32, -bound, bound)


def init_params(key, input_dim, output_dim, hidden_dim):
    h2 = hidden_dim // 2
    ks = jax.random.split(key, 5)
    return {
        # placeholder feature extractor (see TODO above)
        "w_in": _xavier(ks[0], input_dim, hidden_dim),
        "b_in": jnp.zeros((1, hidden_dim), jnp.float32),
        # value head
        "w1v": _xavier(ks[1], hidden_dim, h2),
        "b1v": jnp.zeros((1, h2), jnp.float32),
        "w2v": _xavier(ks[2], h2, 1),
        "b2v": jnp.zeros((1, 1), jnp.float32),
        # advantage head
        "w1a": _xavier(ks[3], hidden_dim, h2),
        "b1a": jnp.zeros((1, h2), jnp.float32),
        "w2a": _xavier(ks[4], h2, output_dim),
        "b2a": jnp.zeros((1, output_dim), jnp.float32),
    }


def dqn_reference(x, params):
    """Plain-JAX f32 reference (un-fused, un-merged, un-folded heads)."""
    h = jnp.maximum(jnp.einsum("bsd,dh->bsh", x, params["w_in"]) + params["b_in"], 0.0)
    feats = jnp.mean(h, axis=1)
    hv = jnp.maximum(feats @ params["w1v"] + params["b1v"], 0.0)
    v = hv @ params["w2v"] + params["b2v"]
    ha = jnp.maximum(feats @ params["w1a"] + params["b1a"], 0.0)
    a = ha @ params["w2a"] + params["b2a"]
    return v + a - jnp.mean(a, axis=1, keepdims=True)


# ---------------------------------------------------------------------------
if __name__ == "__main__":
    B, S, INPUT_DIM, HIDDEN_DIM, OUTPUT_DIM = 2, 8, 16, 32, 4

    key = jax.random.PRNGKey(0)
    k_x, k_p = jax.random.split(key)
    x = jax.random.normal(k_x, (B, S, INPUT_DIM), jnp.float32)
    params = init_params(k_p, INPUT_DIM, OUTPUT_DIM, HIDDEN_DIM)

    q_ref = dqn_reference(x, params)

    # 1) f32 end-to-end: proves the fused/merged/folded kernel math is exact
    #    (up to matmul-association rounding of the folded dueling combine).
    packed_f32 = pack_params(params, compute_dtype=jnp.float32)
    q_f32 = jax.block_until_ready(dqn_forward(x, packed_f32))
    assert q_f32.shape == (B, OUTPUT_DIM)
    assert jnp.allclose(q_f32, q_ref, atol=1e-4), "f32 kernel mismatch vs reference"

    # 2) bf16 MXU operands with f32 accumulation (recommended on v6e/v7x).
    packed_bf16 = pack_params(params, compute_dtype=jnp.bfloat16)
    q_bf16 = jax.block_until_ready(dqn_forward(x, packed_bf16))
    assert q_bf16.shape == (B, OUTPUT_DIM)
    assert jnp.allclose(q_bf16, q_ref, atol=5e-2, rtol=5e-2), "bf16 kernel mismatch vs reference"

    print("KERNEL_OK")
</pallas_src>

<mosaic_0001>
module attributes {stable_mosaic.version = 11 : i64} {
  func.func @_dqn_fused_kernel(%arg0: i32, %arg1: memref<16x16xf32, #tpu.memory_space<vmem>>, %arg2: memref<16x32xf32, #tpu.memory_space<vmem>>, %arg3: memref<1x32xf32, #tpu.memory_space<vmem>>, %arg4: memref<32x32xf32, #tpu.memory_space<vmem>>, %arg5: memref<1x32xf32, #tpu.memory_space<vmem>>, %arg6: memref<32x128xf32, #tpu.memory_space<vmem>>, %arg7: memref<1x128xf32, #tpu.memory_space<vmem>>, %arg8: memref<2x128xf32, #tpu.memory_space<vmem>>) attributes {dimension_semantics = [#tpu.dimension_semantics<parallel>], iteration_bounds = array<i64: 1>, scalar_prefetch = 0 : i64, scratch_operands = 0 : i64, tpu.core_type = #tpu.core_type<tc>, window_params = [{transform_indices = @transform_0, window_bounds = array<i64: 16, 16>}, {pipeline_mode = #tpu.pipeline_mode<synchronous>, transform_indices = @transform_1, window_bounds = array<i64: 16, 32>}, {pipeline_mode = #tpu.pipeline_mode<synchronous>, transform_indices = @transform_2, window_bounds = array<i64: 1, 32>}, {pipeline_mode = #tpu.pipeline_mode<synchronous>, transform_indices = @transform_3, window_bounds = array<i64: 32, 32>}, {pipeline_mode = #tpu.pipeline_mode<synchronous>, transform_indices = @transform_4, window_bounds = array<i64: 1, 32>}, {pipeline_mode = #tpu.pipeline_mode<synchronous>, transform_indices = @transform_5, window_bounds = array<i64: 32, 128>}, {pipeline_mode = #tpu.pipeline_mode<synchronous>, transform_indices = @transform_6, window_bounds = array<i64: 1, 128>}, {transform_indices = @transform_7, window_bounds = array<i64: 2, 128>}]} {
    %c0 = arith.constant 0 : index
    %c0_0 = arith.constant 0 : index
    %0 = vector.load %arg1[%c0, %c0_0] : memref<16x16xf32, #tpu.memory_space<vmem>>, vector<16x16xf32>
    %c0_1 = arith.constant 0 : index
    %c0_2 = arith.constant 0 : index
    %1 = vector.load %arg2[%c0_1, %c0_2] : memref<16x32xf32, #tpu.memory_space<vmem>>, vector<16x32xf32>
    %cst = arith.constant dense<0.000000e+00> : vector<16x32xf32>
    %2 = tpu.matmul %0, %1, %cst {dimension_numbers = #tpu.dot_dimension_numbers<[1], [0], [0], [1], [0, 0, 1, 1], [], []>} : vector<16x16xf32>, vector<16x32xf32>, vector<16x32xf32> -> vector<16x32xf32>
    %c0_3 = arith.constant 0 : index
    %c0_4 = arith.constant 0 : index
    %3 = vector.load %arg3[%c0_3, %c0_4] : memref<1x32xf32, #tpu.memory_space<vmem>>, vector<1x32xf32>
    %4 = vector.broadcast %3 : vector<1x32xf32> to vector<16x32xf32>
    %5 = arith.addf %2, %4 : vector<16x32xf32>
    %cst_5 = arith.constant 0.000000e+00 : f32
    %6 = vector.broadcast %cst_5 : f32 to vector<16x32xf32>
    %7 = arith.maximumf %5, %6 : vector<16x32xf32>
    %8 = vector.shape_cast %7 : vector<16x32xf32> to vector<2x8x32xf32>
    %cst_6 = arith.constant dense<0.000000e+00> : vector<2x32xf32>
    %9 = vector.multi_reduction <add>, %8, %cst_6 [1] : vector<2x8x32xf32> to vector<2x32xf32>
    %cst_7 = arith.constant 8.000000e+00 : f32
    %10 = vector.broadcast %cst_7 : f32 to vector<2x32xf32>
    %11 = arith.divf %9, %10 : vector<2x32xf32>
    %c0_8 = arith.constant 0 : index
    %c0_9 = arith.constant 0 : index
    %12 = vector.load %arg4[%c0_8, %c0_9] : memref<32x32xf32, #tpu.memory_space<vmem>>, vector<32x32xf32>
    %cst_10 = arith.constant dense<0.000000e+00> : vector<2x32xf32>
    %13 = tpu.matmul %11, %12, %cst_10 {dimension_numbers = #tpu.dot_dimension_numbers<[1], [0], [0], [1], [0, 0, 1, 1], [], []>} : vector<2x32xf32>, vector<32x32xf32>, vector<2x32xf32> -> vector<2x32xf32>
    %c0_11 = arith.constant 0 : index
    %c0_12 = arith.constant 0 : index
    %14 = vector.load %arg5[%c0_11, %c0_12] : memref<1x32xf32, #tpu.memory_space<vmem>>, vector<1x32xf32>
    %15 = vector.broadcast %14 : vector<1x32xf32> to vector<2x32xf32>
    %16 = arith.addf %13, %15 : vector<2x32xf32>
    %cst_13 = arith.constant 0.000000e+00 : f32
    %17 = vector.broadcast %cst_13 : f32 to vector<2x32xf32>
    %18 = arith.maximumf %16, %17 : vector<2x32xf32>
    %c0_14 = arith.constant 0 : index
    %c0_15 = arith.constant 0 : index
    %19 = vector.load %arg6[%c0_14, %c0_15] : memref<32x128xf32, #tpu.memory_space<vmem>>, vector<32x128xf32>
    %cst_16 = arith.constant dense<0.000000e+00> : vector<2x128xf32>
    %20 = tpu.matmul %18, %19, %cst_16 {dimension_numbers = #tpu.dot_dimension_numbers<[1], [0], [0], [1], [0, 0, 1, 1], [], []>} : vector<2x32xf32>, vector<32x128xf32>, vector<2x128xf32> -> vector<2x128xf32>
    %c0_17 = arith.constant 0 : index
    %c0_18 = arith.constant 0 : index
    %21 = vector.load %arg7[%c0_17, %c0_18] : memref<1x128xf32, #tpu.memory_space<vmem>>, vector<1x128xf32>
    %22 = vector.broadcast %21 : vector<1x128xf32> to vector<2x128xf32>
    %23 = arith.addf %20, %22 : vector<2x128xf32>
    %c0_19 = arith.constant 0 : index
    %c0_20 = arith.constant 0 : index
    %24 = vector.load %arg8[%c0_19, %c0_20] : memref<2x128xf32, #tpu.memory_space<vmem>>, vector<2x128xf32>
    tpu.vector_store %arg8[%c0_19, %c0_20], %23 {strides = array<i32>} : memref<2x128xf32, #tpu.memory_space<vmem>>, vector<2x128xf32>,
    return
  }
  func.func @transform_0(%arg0: i32) -> (i32, i32) {
    %c0_i32 = arith.constant 0 : i32
    %c0_i32_0 = arith.constant 0 : i32
    return %arg0, %c0_i32 : i32, i32
  }
  func.func @transform_1(%arg0: i32) -> (i32, i32) {
    %c0_i32 = arith.constant 0 : i32
    %c0_i32_0 = arith.constant 0 : i32
    %c0_i32_1 = arith.constant 0 : i32
    return %c0_i32, %c0_i32_0 : i32, i32
  }
  func.func @transform_2(%arg0: i32) -> (i32, i32) {
    %c0_i32 = arith.constant 0 : i32
    %c0_i32_0 = arith.constant 0 : i32
    %c0_i32_1 = arith.constant 0 : i32
    return %c0_i32, %c0_i32_0 : i32, i32
  }
  func.func @transform_3(%arg0: i32) -> (i32, i32) {
    %c0_i32 = arith.constant 0 : i32
    %c0_i32_0 = arith.constant 0 : i32
    %c0_i32_1 = arith.constant 0 : i32
    return %c0_i32, %c0_i32_0 : i32, i32
  }
  func.func @transform_4(%arg0: i32) -> (i32, i32) {
    %c0_i32 = arith.constant 0 : i32
    %c0_i32_0 = arith.constant 0 : i32
    %c0_i32_1 = arith.constant 0 : i32
    return %c0_i32, %c0_i32_0 : i32, i32
  }
  func.func @transform_5(%arg0: i32) -> (i32, i32) {
    %c0_i32 = arith.constant 0 : i32
    %c0_i32_0 = arith.constant 0 : i32
    %c0_i32_1 = arith.constant 0 : i32
    return %c0_i32, %c0_i32_0 : i32, i32
  }
  func.func @transform_6(%arg0: i32) -> (i32, i32) {
    %c0_i32 = arith.constant 0 : i32
    %c0_i32_0 = arith.constant 0 : i32
    %c0_i32_1 = arith.constant 0 : i32
    return %c0_i32, %c0_i32_0 : i32, i32
  }
  func.func @transform_7(%arg0: i32) -> (i32, i32) {
    %c0_i32 = arith.constant 0 : i32
    %c0_i32_0 = arith.constant 0 : i32
    return %arg0, %c0_i32 : i32, i32
  }
}

</mosaic_0001>

<bundles_post_ra>
// kernel: tpu_custom_call.1
= control target key start
LH: loop header
LB: loop body
LE: loop exit
PB: predicated region body
PF: predicated region fallthrough
CT: control target
= control target key end

     0   :  { %12 = vsyncpa [#allocation3], 0  ;;  %s728_s0 = inlined_call_operand.hbm [shape: f32[16,16], index: 0, kind: input, shape index: {}]   ;;  %s729_s1 = inlined_call_operand.hbm [shape: f32[16,32], index: 1, kind: input, shape index: {}]   ;;  %s730_s2 = inlined_call_operand.vmem [shape: f32[1,32], index: 2, kind: input, shape index: {}]   ;;  %s731_s3 = inlined_call_operand.hbm [shape: f32[32,32], index: 3, kind: input, shape index: {}]   ;;  %s732_s4 = inlined_call_operand.vmem [shape: f32[1,32], index: 4, kind: input, shape index: {}]   ;;  %s733_s5 = inlined_call_operand.hbm [shape: f32[32,128], index: 5, kind: input, shape index: {}]   ;;  %s734_s6 = inlined_call_operand.vmem [shape: f32[1,128], index: 6, kind: input, shape index: {}]   ;;  %s735_s7 = inlined_call_operand.hbm [shape: f32[2,128], index: 7, kind: output, shape index: {}]  }
   0x1   :  { %13 = vsyncpa [#allocation6], 0 }
   0x2   :  { %14 = vsyncpa [#allocation9], 0 }
   0x3   :  { %15 = vsyncpa [#allocation4], 0  ;;  %s579_s24 = smov [#allocation5]   ;;  %s580_s26 = smov [#allocation2]  }
   0x4   :  { %s33_s25 = sshll.u32 %s579_s24, 4  ;;  %s21_s27 = sshll.u32 %s580_s26, 4  ;;  %s34_s25 = int_to_ptr.vmem [resolvable:$true] %s33_s25  ;;  %s629_s27 = int_to_ptr.vmem [resolvable:$true] %s21_s27 }
   0x5   :  { %s461_s30 = scalar_lea.hbm %s729_s1, 256 }
   0x6   :  { %p462_p0 = scmp.ne.s32.totalorder %s729_s1, %s461_s30  ;;  %p465_p1 = scmp.lt.u32.totalorder %s461_s30, %s729_s1 }
   0x8   :  { %p467_p2 = pnand %p465_p1, %p462_p0 }
   0xa   :  { %470 = shalt.err (!%p467_p2)
}
   0xb   :  { %s471_s12 = scalar_lea.vmem %s34_s25, 256  ;;  %p476_p4 = scmp.lt.s32.totalorder %s34_s25, %s34_s25 }
   0xc   :  { %p472_p3 = scmp.ne.s32.totalorder %s34_s25, %s471_s12  ;;  %p477_p5 = scmp.lt.s32.totalorder %s471_s12, %s471_s12 }
   0xe   :  { %p478_p6 = por %p477_p5, %p476_p4 }
  0x10   :  { %p479_p7 = pnand %p478_p6, %p472_p3 }
  0x12   :  { %482 = shalt.err (!%p479_p7)
}
  0x13   :  { %s581_s13 = smov 128   ;;  %s582_s14 = smov 8  }
  0x14   :  { %39 = dma.hbm_to_vmem [thread:$0]  %s729_s1, 256, %s34_s25, [#allocation6], %s581_s13, %s581_s13, %s582_s14  }
  0x15   :  { %s483_s19 = scalar_lea.hbm %s728_s0, 256 }
  0x16   :  { %p484_p8 = scmp.ne.s32.totalorder %s728_s0, %s483_s19  ;;  %p487_p9 = scmp.lt.u32.totalorder %s483_s19, %s728_s0 }
  0x18   :  { %p489_p10 = pnand %p487_p9, %p484_p8 }
  0x1a   :  { %492 = shalt.err (!%p489_p10)
}
  0x1b   :  { %s493_s24 = scalar_lea.vmem %s629_s27, 256  ;;  %p498_p12 = scmp.lt.s32.totalorder %s629_s27, %s629_s27 }
  0x1c   :  { %p494_p11 = scmp.ne.s32.totalorder %s629_s27, %s493_s24  ;;  %p499_p13 = scmp.lt.s32.totalorder %s493_s24, %s493_s24 }
  0x1e   :  { %p500_p0 = por %p499_p13, %p498_p12 }
  0x20   :  { %p501_p1 = pnand %p500_p0, %p494_p11 }
  0x22   :  { %504 = shalt.err (!%p501_p1)
}
  0x23   :  { %27 = dma.hbm_to_vmem [thread:$0]  %s728_s0, 256, %s629_s27, [#allocation3], %s581_s13, %s581_s13, %s582_s14  }
  0x24   :  { %s583_s26 = smov [#allocation7]   ;;  %s584_s29 = smov [#allocation8]  }
  0x25   :  { %s47_s28 = sshll.u32 %s583_s26, 4  ;;  %s61_s30 = sshll.u32 %s584_s29, 4  ;;  %s48_s28 = int_to_ptr.vmem [resolvable:$true] %s47_s28  ;;  %s666_s30 = int_to_ptr.vmem [resolvable:$true] %s61_s30 }
  0x26   :  { %s505_s10 = scalar_lea.hbm %s731_s3, 512 }
  0x27   :  { %p506_p2 = scmp.ne.s32.totalorder %s731_s3, %s505_s10  ;;  %p509_p3 = scmp.lt.u32.totalorder %s505_s10, %s731_s3 }
  0x29   :  { %p511_p4 = pnand %p509_p3, %p506_p2 }
  0x2b   :  { %514 = shalt.err (!%p511_p4)
}
  0x2c   :  { %s515_s0 = scalar_lea.vmem %s48_s28, 512  ;;  %p520_p6 = scmp.lt.s32.totalorder %s48_s28, %s48_s28 }
  0x2d   :  { %p516_p5 = scmp.ne.s32.totalorder %s48_s28, %s515_s0  ;;  %p521_p7 = scmp.lt.s32.totalorder %s515_s0, %s515_s0 }
  0x2f   :  { %p522_p8 = por %p521_p7, %p520_p6 }
  0x31   :  { %p523_p9 = pnand %p522_p8, %p516_p5 }
  0x33   :  { %526 = shalt.err (!%p523_p9)
}
  0x34   :  { %53 = dma.hbm_to_vmem [thread:$0]  %s731_s3, 512, %s48_s28, [#allocation6], %s581_s13, %s581_s13, %s582_s14  }
  0x35   :  { %s527_s20 = scalar_lea.hbm %s733_s5, 512 }
  0x36   :  { %p528_p10 = scmp.ne.s32.totalorder %s733_s5, %s527_s20  ;;  %p531_p11 = scmp.lt.u32.totalorder %s527_s20, %s733_s5 }
  0x38   :  { %p533_p12 = pnand %p531_p11, %p528_p10 }
  0x3a   :  { %536 = shalt.err (!%p533_p12)
}
  0x3b   :  { %s537_s1 = scalar_lea.vmem %s666_s30, 512  ;;  %p542_p0 = scmp.lt.s32.totalorder %s666_s30, %s666_s30 }
  0x3c   :  { %p538_p13 = scmp.ne.s32.totalorder %s666_s30, %s537_s1  ;;  %p543_p1 = scmp.lt.s32.totalorder %s537_s1, %s537_s1 }
  0x3e   :  { %p544_p2 = por %p543_p1, %p542_p0 }
  0x40   :  { %p545_p3 = pnand %p544_p2, %p538_p13 }
  0x42   :  { %548 = shalt.err (!%p545_p3)
}
  0x43   :  { %67 = dma.hbm_to_vmem [thread:$0]  %s733_s5, 512, %s666_s30, [#allocation9], %s581_s13, %s581_s13, %s582_s14  }
  0x44   :  { %571 = dma.done.wait [#allocation3], 256  }
  0x45   :  { %572 = vsyncadd [#allocation3], 4294967040 }
  0x46   :  { %573 = dma.done.wait [#allocation6], 768  }
  0x47   :  { %574 = vsyncadd [#allocation6], 4294966528 }
  0x48   :  { %575 = dma.done.wait [#allocation9], 512  }
  0x49   :  { %576 = vsyncadd [#allocation9], 4294966784  ;;  %vm93_vm0 = vcmask 130048   ;;  %v84_v0 = vld [vmem:[#allocation5] sm:$0xff]  ;;  %v85_v1 = vld [vmem:[#allocation5 + $0x8] sm:$0xff]  ;;  %v585_v8 = vmov 0.0|0.0  }
  0x4a   :  { %v82_v2 = vld [vmem:[#allocation2] sm:$0xff]  ;;  %v435_v3 = vpack.c.bf16 %v85_v1, %v84_v0  ;;  %v83_v4 = vld [vmem:[#allocation2 + $0x8] sm:$0xff]  ;;  %439 = vmatprep.subr.bf16.mxu1 %v585_v8  ;;  %v197_v9 = vld [vmem:[#allocation7 + $0x10] sm:$0xff]  ;;  %vm586_vm1 = vmmov 0   ;;  %v587_v12 = vmov 0.0   ;;  %vm177_vm2 = vcmask 261120  }
  0x4b   :  { %410 = vmatprep.mubr.msk.f32.mxu0 %vm93_vm0, %v82_v2  ;;  %v195_v5 = vld [vmem:[#allocation7] sm:$0xff]  ;;  %v196_v6 = vld [vmem:[#allocation7 + $0x8] sm:$0xff]  ;;  %v198_v10 = vld [vmem:[#allocation7 + $0x18] sm:$0xff]  ;;  %421 = vmatprep.mubr.msk.f32.mxu1 %vm586_vm1, %v587_v12  ;;  %vm208_vm3 = vcmask 1041409   ;;  %s588_s29 = smov [#allocation10]  }
  0x4c   :  { %436 = vmatprep.subr.bf16.mxu0 %v435_v3  ;;  %v440_v7 = vpack.c.bf16 %v196_v6, %v195_v5  ;;  %v443_v11 = vpack.c.bf16 %v198_v10, %v197_v9  ;;  %v283_v13 = vld [vmem:[#allocation8] sm:$0xff]  ;;  %v284_v14 = vld [vmem:[#allocation8 + $0x8] sm:$0xff]  ;;  %v285_v40 = vld [vmem:[#allocation8 + $0x10] sm:$0xff]  ;;  %s374_s30 = sshll.u32 %s588_s29, 4  ;;  %s375_s30 = int_to_ptr.vmem [resolvable:$true] %s374_s30 }
  0x4d   :  { %438 = vmatpush3.bf16.msra.mxu0 %v435_v3  ;;  %v446_v15 = vpack.c.bf16 %v284_v14, %v283_v13  ;;  %v385_v16 = vld [vmem:[%s730_s2] ss:$0 sm:$0xff]  ;;  %v286_v41 = vld [vmem:[#allocation8 + $0x18] sm:$0xff]  ;;  %s549_s8 = scalar_lea.vmem %s375_s30, 32  ;;  %p554_p5 = scmp.lt.s32.totalorder %s375_s30, %s375_s30 }
  0x4e   :  { %445 = vmatprep.subr.bf16.mxu0 %v585_v8  ;;  %441 = vmatpush3.bf16.msra.mxu1 %v440_v7  ;;  %v449_v42 = vpack.c.bf16 %v286_v41, %v285_v40  ;;  %v388_v43 = vld [vmem:[%s732_s4] ss:$0 sm:$0xff]  ;;  %p550_p4 = scmp.ne.s32.totalorder %s375_s30, %s549_s8  ;;  %p555_p6 = scmp.lt.s32.totalorder %s549_s8, %s549_s8 }
  0x4f   :  { %442 = vmatprep.subr.bf16.mxu1 %v585_v8  ;;  %v390_v48 = vld [vmem:[%s734_s6] ss:$0 sm:$0xff] }
  0x50   :  { %411 = vmatmul.mubr.msk.f32.vlgmr.msra.gmra.mrb[0].mxu0 %vm93_vm0, %v83_v4  ;;  %p556_p7 = por %p555_p6, %p554_p5 }
  0x51   :  { %432 = vmatprep.mubr.msk.f32.mxu0 %vm586_vm1, %v587_v12  ;;  %447 = vmatpush3.bf16.msra.mxu0 %v446_v15 }
  0x52   :  { %444 = vmatpush3.bf16.msra.mxu1 %v443_v11  ;;  %448 = vmatprep.subr.bf16.mxu0 %v585_v8  ;;  %p557_p8 = pnand %p556_p7, %p550_p4 }
  0x55   :  { %450 = vmatpush3.bf16.msra.mxu0 %v449_v42 }
 0x123   :  { %v412_v17 = vpop.f32.mrb[0].mxu0 }
 0x124   :  { %v172_v18 = vadd.f32 %v412_v17, %v385_v16  ;;  %v166_v19 = vpop.f32.mrb[1].mxu0 }
 0x125   :  { %v167_v20 = vadd.f32 %v385_v16, %v166_v19 }
 0x126   :  { %v176_v21 = vmax.f32 %v172_v18, 0.0 }
 0x127   :  { %v175_v22 = vmax.f32 %v167_v20, 0.0 }
 0x128   :  { %v185_v23 = vsel %vm177_vm2, %v176_v21, 0.0 }
 0x129   :  { %v186_v24 = vrot.slane %v185_v23, 4  ;;  %v178_v25 = vsel %vm177_vm2, %v175_v22, 0.0 }
 0x12a   :  { %v179_v26 = vrot.slane %v178_v25, 4 }
 0x12b   :  { %v187_v27 = vadd.f32 %v186_v24, %v185_v23 }
 0x12c   :  { %v180_v28 = vadd.f32 %v179_v26, %v178_v25 }
 0x12d   :  { %v188_v29 = vrot.slane %v187_v27, 2 }
 0x12e   :  { %v181_v30 = vrot.slane %v180_v28, 2 }
 0x12f   :  { %v189_v31 = vadd.f32 %v188_v29, %v187_v27 }
 0x130   :  { %v182_v32 = vadd.f32 %v181_v30, %v180_v28 }
 0x131   :  { %v190_v33 = vrot.slane %v189_v31, 1 }
 0x132   :  { %v183_v34 = vrot.slane %v182_v32, 1 }
 0x133   :  { %v191_v35 = vadd.f32 %v190_v33, %v189_v31 }
 0x134   :  { %v184_v36 = vadd.f32 %v183_v34, %v182_v32 }
 0x135   :  { %v194_v37 = vmul.f32 0.125, %v191_v35 }
 0x136   :  { %v193_v38 = vmul.f32 0.125, %v184_v36 }
 0x138   :  { %v209_v39 = vsel %vm208_vm3, %v194_v37, %v193_v38 }
 0x139   :  { %422 = vmatmul.mubr.msk.f32.vlgmr.msra.gmra.mrb[0].mxu1 %vm177_vm2, %v209_v39 }
 0x20c   :  { %v278_v44 = vpop.f32.mrb[0].mxu1 }
 0x20d   :  { %v279_v45 = vadd.f32 %v388_v43, %v278_v44  ;;  %v423_v46 = vpop.f32.mrb[1].mxu1 }
 0x20f   :  { %v282_v47 = vmax.f32 %v279_v45, 0.0 }
 0x211   :  { %433 = vmatmul.mubr.msk.f32.vlgmr.msra.gmra.mrb[2].mxu0 %vm177_vm2, %v282_v47 }
 0x2e4   :  { %v363_v49 = vpop.f32.mrb[2].mxu0 }
 0x2e5   :  { %v364_v50 = vadd.f32 %v390_v48, %v363_v49  ;;  %v434_v51 = vpop.f32.mrb[3].mxu0 }
 0x2e7   :  { %367 = vst [vmem:[#allocation10] sm:$0x3] %v364_v50 }
 0x2e8   :  { %560 = shalt.err (!%p557_p8)
}
 0x2e9   :  { %s561_s10 = scalar_lea.hbm %s735_s7, 32 }
 0x2ea   :  { %p562_p9 = scmp.ne.s32.totalorder %s735_s7, %s561_s10  ;;  %p565_p10 = scmp.lt.u32.totalorder %s561_s10, %s735_s7 }
 0x2ec   :  { %p567_p11 = pnand %p565_p10, %p562_p9 }
 0x2ee   :  { %570 = shalt.err (!%p567_p11)
}
 0x2ef   :  { %377 = dma.vmem_to_hbm [thread:$0]  %s375_s30, 32, %s735_s7, [#allocation4]  }
 0x2f0   :  { %577 = dma.done.wait [#allocation4], 32  }
 0x2f1   :  { %578 = vsyncadd [#allocation4], 4294967264 }
 0x2f2   :  { %381 = vsyncpa [#allocation3], 1 }
 0x2f3   :  { %382 = vsyncpa [#allocation6], 1 }
 0x2f4   :  { %383 = vsyncpa [#allocation9], 1 }
 0x2f5   :  { %384 = vsyncpa [#allocation4], 1 }

</bundles_post_ra>
